<compile_context>
chip_gen: v6e
topology: v6e:2x2x1
jax: 0.10.0
libtpu: 0.0.40
codegen_flags: <defaults>
</compile_context>

<pallas_src>
import functools

import jax
import jax.numpy as jnp
from jax import lax
from jax.experimental import pallas as pl
from jax.experimental.pallas import tpu as pltpu

LANES = 128
SUBLANES = 8
VREG_ELEMS = SUBLANES * LANES          # 1024 elements = one (8, 128) tile
_MIN_PALLAS_ELEMS = 16 * 1024          # below this, plain jnp is strictly faster


def _default_block_groups(itemsize: int) -> int:
    """Number of (8,128) groups per tile, targeting ~2-4 MiB per input buffer."""
    try:
        kind = jax.devices()[0].device_kind.lower()
    except Exception:  # pragma: no cover - detection is best-effort
        kind = ""
    # v5e: 16 MiB default scoped VMEM -> 2 MiB buffers; v6e/v7x: 4 MiB buffers.
    target_bytes = (2 << 20) if "v5" in kind else (4 << 20)
    gb = target_bytes // (VREG_ELEMS * itemsize)
    return int(max(1, min(gb, 2048)))


def _make_mse_kernel(gb: int, valid_groups: int, needs_mask: bool):
    """Accumulate sum((V-ve)^2) over (gb, 8, 128) tiles into an (8, 128) block."""

    def kernel(v_ref, ve_ref, o_ref):
        @pl.when(pl.program_id(0) == 0)
        def _():
            o_ref[...] = jnp.zeros_like(o_ref)

        d = v_ref[...].astype(jnp.float32) - ve_ref[...].astype(jnp.float32)
        sq = d * d
        if needs_mask:
            # Last grid block is partial: rows past the true extent hold
            # unspecified data.  Bulk is vreg-aligned, so masking whole
            # (8, 128) groups is exact.  `valid_groups` is a static constant.
            g = (pl.program_id(0) * gb
                 + lax.broadcasted_iota(jnp.int32, (gb, SUBLANES, LANES), 0))
            sq = jnp.where(g < valid_groups, sq, 0.0)
        # Sum over the leading (vreg-group) axis: pure VALU adds, no XLU work.
        o_ref[...] += jnp.sum(sq, axis=0)

    return kernel


def _mse_reference(V, ve):
    d = V.astype(jnp.float32) - ve.astype(jnp.float32)
    return jnp.mean(d * d)


@functools.partial(jax.jit, static_argnames=("block_rows",))
def critic_loss(V, ve, *, block_rows=None):
    """MSE loss mean((V - ve)**2) with a fused, memory-bound Pallas reduction."""
    assert V.shape == ve.shape, (V.shape, ve.shape)
    n = V.size
    assert n > 0

    # Tiny inputs (e.g. the (2, 1) critic example): skip the kernel entirely.
    if n < _MIN_PALLAS_ELEMS:
        return _mse_reference(V, ve)

    flat_v = V.reshape(-1)
    flat_ve = ve.reshape(-1)

    # Vreg-aligned bulk goes through the kernel; the <1024-element tail is a
    # negligible pure-JAX reduce.  No padded copy of the inputs is created.
    n_bulk = (n // VREG_ELEMS) * VREG_ELEMS
    if n_bulk == 0:
        return _mse_reference(V, ve)
    groups = n_bulk // VREG_ELEMS

    itemsize = max(jnp.dtype(V.dtype).itemsize, jnp.dtype(ve.dtype).itemsize)
    if block_rows is None:
        gb = _default_block_groups(itemsize)
    else:
        gb = max(1, int(block_rows) // SUBLANES)
    gb = min(gb, groups)
    grid_steps = pl.cdiv(groups, gb)
    needs_mask = (groups % gb) != 0

    if n_bulk == n:
        bulk_v = flat_v.reshape(groups, SUBLANES, LANES)
        bulk_ve = flat_ve.reshape(groups, SUBLANES, LANES)
        tail_sq = jnp.float32(0.0)
    else:
        bulk_v = flat_v[:n_bulk].reshape(groups, SUBLANES, LANES)
        bulk_ve = flat_ve[:n_bulk].reshape(groups, SUBLANES, LANES)
        tail_d = (flat_v[n_bulk:].astype(jnp.float32)
                  - flat_ve[n_bulk:].astype(jnp.float32))
        tail_sq = jnp.sum(tail_d * tail_d)

    block_bytes = gb * VREG_ELEMS * itemsize
    # 2 inputs x 2 pipeline buffers + headroom; explicit so the default scoped
    # limit (16 MiB on v5e) can never reject the chosen tile size.
    vmem_limit = int(min(64 << 20, 4 * block_bytes + (4 << 20)))

    kernel = _make_mse_kernel(gb, groups, needs_mask)
    partial = pl.pallas_call(
        kernel,
        out_shape=jax.ShapeDtypeStruct((SUBLANES, LANES), jnp.float32),
        grid_spec=pltpu.PrefetchScalarGridSpec(
            num_scalar_prefetch=0,
            grid=(grid_steps,),
            in_specs=[
                pl.BlockSpec((gb, SUBLANES, LANES), lambda i: (i, 0, 0)),  # V
                pl.BlockSpec((gb, SUBLANES, LANES), lambda i: (i, 0, 0)),  # ve
            ],
            # Constant index_map -> resident (8,128) accumulator across the grid.
            out_specs=pl.BlockSpec((SUBLANES, LANES), lambda i: (0, 0)),
        ),
        compiler_params=pltpu.CompilerParams(
            dimension_semantics=("arbitrary",),       # reduction axis
            vmem_limit_bytes=vmem_limit),
    )(bulk_v, bulk_ve)

    # Tiny finish: (8,128) -> scalar, add tail, divide by the TRUE count.
    return (jnp.sum(partial) + tail_sq) / jnp.float32(n)


if __name__ == "__main__":
    key = jax.random.PRNGKey(0)
    k1, k2, k3, k4, k5, k6 = jax.random.split(key, 6)

    # 1) Exercises the Pallas kernel with a ragged element count (tail path),
    #    a multi-step grid and in-kernel masking of the partial last block.
    V1 = jax.random.normal(k1, (80, 517), dtype=jnp.float32)
    ve1 = jax.random.normal(k2, (80, 517), dtype=jnp.float32)
    out1 = jax.block_until_ready(critic_loss(V1, ve1, block_rows=96))
    ref1 = _mse_reference(V1, ve1)
    assert out1.shape == (), out1.shape
    assert jnp.allclose(out1, ref1, rtol=1e-5, atol=1e-6), (float(out1), float(ref1))

    # 2) Exercises the default (device/dtype-aware) tile and the aligned,
    #    tail-free, slice-free path.
    V2 = jax.random.normal(k3, (256, 1024), dtype=jnp.float32)
    ve2 = jax.random.normal(k4, (256, 1024), dtype=jnp.float32)
    out2 = jax.block_until_ready(critic_loss(V2, ve2))
    ref2 = _mse_reference(V2, ve2)
    assert jnp.allclose(out2, ref2, rtol=1e-5, atol=1e-6), (float(out2), float(ref2))

    # 3) Tiny critic-sized input (batch=2, 1): pure-JAX fast path.
    V3 = jax.random.normal(k5, (2, 1), dtype=jnp.float32)
    ve3 = jax.random.normal(k6, (2, 1), dtype=jnp.float32)
    out3 = jax.block_until_ready(critic_loss(V3, ve3))
    ref3 = _mse_reference(V3, ve3)
    assert jnp.allclose(out3, ref3, rtol=1e-6, atol=1e-7), (float(out3), float(ref3))

    print("KERNEL_OK")
</pallas_src>

<mosaic_0001>
module attributes {stable_mosaic.version = 11 : i64} {
  func.func @kernel(%arg0: i32, %arg1: memref<12x8x128xf32, #tpu.memory_space<vmem>>, %arg2: memref<12x8x128xf32, #tpu.memory_space<vmem>>, %arg3: memref<8x128xf32, #tpu.memory_space<vmem>>) attributes {dimension_semantics = [#tpu.dimension_semantics<arbitrary>], iteration_bounds = array<i64: 4>, scalar_prefetch = 0 : i64, scratch_operands = 0 : i64, tpu.core_type = #tpu.core_type<tc>, window_params = [{transform_indices = @transform_0, window_bounds = array<i64: 12, 8, 128>}, {transform_indices = @transform_1, window_bounds = array<i64: 12, 8, 128>}, {pipeline_mode = #tpu.pipeline_mode<synchronous>, transform_indices = @transform_2, window_bounds = array<i64: 8, 128>}]} {
    %c0_i32 = arith.constant 0 : i32
    %0 = arith.cmpi eq, %arg0, %c0_i32 : i32
    %1 = arith.extui %0 : i1 to i32
    %c0_i32_0 = arith.constant 0 : i32
    %2 = arith.cmpi ne, %1, %c0_i32_0 : i32
    scf.if %2 {
      %cst_11 = arith.constant 0.000000e+00 : f32
      %19 = vector.broadcast %cst_11 : f32 to vector<8x128xf32>
      %c0_12 = arith.constant 0 : index
      %c0_13 = arith.constant 0 : index
      %20 = vector.load %arg3[%c0_12, %c0_13] : memref<8x128xf32, #tpu.memory_space<vmem>>, vector<8x128xf32>
      tpu.vector_store %arg3[%c0_12, %c0_13], %19 {strides = array<i32>} : memref<8x128xf32, #tpu.memory_space<vmem>>, vector<8x128xf32>,
    } else {
    }
    %c0 = arith.constant 0 : index
    %c0_1 = arith.constant 0 : index
    %c0_2 = arith.constant 0 : index
    %3 = vector.load %arg1[%c0, %c0_1, %c0_2] : memref<12x8x128xf32, #tpu.memory_space<vmem>>, vector<12x8x128xf32>
    %c0_3 = arith.constant 0 : index
    %c0_4 = arith.constant 0 : index
    %c0_5 = arith.constant 0 : index
    %4 = vector.load %arg2[%c0_3, %c0_4, %c0_5] : memref<12x8x128xf32, #tpu.memory_space<vmem>>, vector<12x8x128xf32>
    %5 = arith.subf %3, %4 : vector<12x8x128xf32>
    %6 = arith.mulf %5, %5 : vector<12x8x128xf32>
    %c12_i32 = arith.constant 12 : i32
    %7 = arith.muli %arg0, %c12_i32 : i32
    %8 = tpu.iota {dimensions = array<i32: 0>} : vector<12x8x128xi32>
    %9 = vector.broadcast %7 : i32 to vector<12x8x128xi32>
    %10 = arith.addi %9, %8 : vector<12x8x128xi32>
    %c40_i32 = arith.constant 40 : i32
    %11 = vector.broadcast %c40_i32 : i32 to vector<12x8x128xi32>
    %12 = arith.cmpi slt, %10, %11 : vector<12x8x128xi32>
    %cst = arith.constant 0.000000e+00 : f32
    %13 = vector.broadcast %cst : f32 to vector<12x8x128xf32>
    %14 = arith.select %12, %6, %13 : vector<12x8x128xi1>, vector<12x8x128xf32>
    %c0_6 = arith.constant 0 : index
    %c0_7 = arith.constant 0 : index
    %15 = vector.load %arg3[%c0_6, %c0_7] : memref<8x128xf32, #tpu.memory_space<vmem>>, vector<8x128xf32>
    %cst_8 = arith.constant dense<0.000000e+00> : vector<8x128xf32>
    %16 = vector.multi_reduction <add>, %14, %cst_8 [0] : vector<12x8x128xf32> to vector<8x128xf32>
    %17 = arith.addf %15, %16 : vector<8x128xf32>
    %c0_9 = arith.constant 0 : index
    %c0_10 = arith.constant 0 : index
    %18 = vector.load %arg3[%c0_9, %c0_10] : memref<8x128xf32, #tpu.memory_space<vmem>>, vector<8x128xf32>
    tpu.vector_store %arg3[%c0_9, %c0_10], %17 {strides = array<i32>} : memref<8x128xf32, #tpu.memory_space<vmem>>, vector<8x128xf32>,
    return
  }
  func.func @transform_0(%arg0: i32) -> (i32, i32, i32) {
    %c0_i32 = arith.constant 0 : i32
    %c0_i32_0 = arith.constant 0 : i32
    %c0_i32_1 = arith.constant 0 : i32
    return %arg0, %c0_i32, %c0_i32_0 : i32, i32, i32
  }
  func.func @transform_1(%arg0: i32) -> (i32, i32, i32) {
    %c0_i32 = arith.constant 0 : i32
    %c0_i32_0 = arith.constant 0 : i32
    %c0_i32_1 = arith.constant 0 : i32
    return %arg0, %c0_i32, %c0_i32_0 : i32, i32, i32
  }
  func.func @transform_2(%arg0: i32) -> (i32, i32) {
    %c0_i32 = arith.constant 0 : i32
    %c0_i32_0 = arith.constant 0 : i32
    %c0_i32_1 = arith.constant 0 : i32
    return %c0_i32, %c0_i32_0 : i32, i32
  }
}

</mosaic_0001>

<bundles_post_ra>
// kernel: critic_loss.1
= control target key start
LH: loop header
LB: loop body
LE: loop exit
PB: predicated region body
PF: predicated region fallthrough
CT: control target
= control target key end

     0   :  { %s379_s9 = smov 0   ;;  %s447_s0 = inlined_call_operand.vmem [shape: f32[40,8,128], index: 0, kind: input, shape index: {}]   ;;  %s448_s1 = inlined_call_operand.vmem [shape: f32[40,8,128], index: 1, kind: input, shape index: {}]   ;;  %s449_s2 = inlined_call_operand.vmem [shape: f32[8,128], index: 2, kind: output, shape index: {}]  }
   0x1 LB: > { %s337_s10 = sadd.s32 4294967295, %s361_s9   ;;  %p340_p0 = scmp.ge.s32.totalorder %s361_s9, 1  ;;  %s361_s9 = sphi %s379_s9, %s12_s9  }
   0x2   : > { %p135_p1 = scmp.lt.s32.totalorder %s361_s9, 5 }
   0x4   : > { %p136_p2 = pnand %p340_p0, %p135_p1 }
   0x5   : > { %s165_s11 = smul.u32 (!%p136_p2), 12, %s337_s10  ;;  %p343_p4 = scmp.ne.s32.totalorder (!%p136_p2), %s337_s10, 0 }
   0x6   : > { %139 = sbr.rel (%p136_p2) target bundleno = 52 (0x34), region = 28 }
   0x7   : > { %p170_p3 = scmp.lt.s32.totalorder (!%p136_p2), %s165_s11, 39 }
   0xb   : > { %s171_s12 = scalar_select %p170_p3, %s165_s11, 39 }
   0xc   : > { %196 = sbr.rel (%p343_p4) target bundleno = 19 (0x13), region = 32 }
   0xd   : > { %s341_s13 = sshll.u32 %s171_s12, 3 }
   0xe   : > { %s390_s16 = scalar_lea.vmem %s447_s0, %s341_s13  ;;  %s395_s19 = scalar_lea.vmem %s448_s1, %s341_s13 }
  0x11   : > { %v363_v0 = vmov 0.0  }
  0x12   : > { %197 = vst [vmem:[%s449_s2] sm:$0xff] %v363_v0 }
  0x13 PF: > { %v198_v1 = vld [vmem:[%s390_s16] sm:$0xff]  ;;  %v199_v2 = vld [vmem:[%s390_s16 + $0x8] sm:$0xff]  ;;  %v200_v3 = vld [vmem:[%s390_s16 + $0x10] sm:$0xff]  ;;  %v406_v7 = vstv %s165_s11 }
  0x14   : > { %v210_v4 = vld [vmem:[%s395_s19] sm:$0xff]  ;;  %v211_v5 = vld [vmem:[%s395_s19 + $0x8] sm:$0xff]  ;;  %v212_v6 = vld [vmem:[%s395_s19 + $0x10] sm:$0xff]  ;;  %v248_v13 = vadd.s32 1, %v406_v7  ;;  %v249_v16 = vadd.s32 2, %v406_v7  ;;  %v250_v22 = vadd.s32 3, %v406_v7 }
  0x15   : > { %v222_v8 = vsub.f32 %v198_v1, %v210_v4  ;;  %v201_v9 = vld [vmem:[%s390_s16 + $0x18] sm:$0xff]  ;;  %v223_v11 = vsub.f32 %v199_v2, %v211_v5  ;;  %v224_v12 = vsub.f32 %v200_v3, %v212_v6  ;;  %v202_v14 = vld [vmem:[%s390_s16 + $0x20] sm:$0xff]  ;;  %v203_v19 = vld [vmem:[%s390_s16 + $0x28] sm:$0xff]  ;;  %vm259_vm0 = vcmp.lt.s32.totalorder %v406_v7, 40 }
  0x16   : > { %v213_v10 = vld [vmem:[%s395_s19 + $0x18] sm:$0xff]  ;;  %v214_v15 = vld [vmem:[%s395_s19 + $0x20] sm:$0xff]  ;;  %v215_v20 = vld [vmem:[%s395_s19 + $0x28] sm:$0xff]  ;;  %vm260_vm1 = vcmp.lt.s32.totalorder %v248_v13, 40  ;;  %v251_v27 = vadd.s32 4, %v406_v7  ;;  %vm261_vm2 = vcmp.lt.s32.totalorder %v249_v16, 40 }
  0x17   : > { %v225_v17 = vsub.f32 %v201_v9, %v213_v10  ;;  %v234_v18 = vmul.f32 %v222_v8, %v222_v8  ;;  %v235_v21 = vmul.f32 %v223_v11, %v223_v11  ;;  %v226_v23 = vsub.f32 %v202_v14, %v214_v15  ;;  %v204_v25 = vld [vmem:[%s390_s16 + $0x30] sm:$0xff]  ;;  %v205_v31 = vld [vmem:[%s390_s16 + $0x38] sm:$0xff]  ;;  %v206_v38 = vld [vmem:[%s390_s16 + $0x40] sm:$0xff] }
  0x18   : > { %v236_v24 = vmul.f32 %v224_v12, %v224_v12  ;;  %v216_v26 = vld [vmem:[%s395_s19 + $0x30] sm:$0xff]  ;;  %v227_v28 = vsub.f32 %v203_v19, %v215_v20  ;;  %v217_v32 = vld [vmem:[%s395_s19 + $0x38] sm:$0xff]  ;;  %v252_v33 = vadd.s32 5, %v406_v7  ;;  %vm262_vm3 = vcmp.lt.s32.totalorder %v250_v22, 40  ;;  %v218_v39 = vld [vmem:[%s395_s19 + $0x40] sm:$0xff] }
  0x19   : > { %v237_v29 = vmul.f32 %v225_v17, %v225_v17  ;;  %v271_v30 = vsel %vm259_vm0, %v234_v18, 0.0  ;;  %v272_v34 = vsel %vm260_vm1, %v235_v21, 0.0  ;;  %v228_v35 = vsub.f32 %v204_v25, %v216_v26  ;;  %v207_v45 = vld [vmem:[%s390_s16 + $0x48] sm:$0xff]  ;;  %v208_v52 = vld [vmem:[%s390_s16 + $0x50] sm:$0xff]  ;;  %v209_v59 = vld [vmem:[%s390_s16 + $0x58] sm:$0xff] }
  0x1a   : > { %v238_v36 = vmul.f32 %v226_v23, %v226_v23  ;;  %v273_v37 = vsel %vm261_vm2, %v236_v24, 0.0  ;;  %v253_v40 = vadd.s32 6, %v406_v7  ;;  %vm263_vm4 = vcmp.lt.s32.totalorder %v251_v27, 40  ;;  %v219_v46 = vld [vmem:[%s395_s19 + $0x48] sm:$0xff]  ;;  %v220_v53 = vld [vmem:[%s395_s19 + $0x50] sm:$0xff]  ;;  %v221_v60 = vld [vmem:[%s395_s19 + $0x58] sm:$0xff] }
  0x1b   : > { %v284_v41 = vadd.f32 %v272_v34, %v271_v30  ;;  %v229_v42 = vsub.f32 %v205_v31, %v217_v32  ;;  %v239_v43 = vmul.f32 %v227_v28, %v227_v28  ;;  %v274_v44 = vsel %vm262_vm3, %v237_v29, 0.0  ;;  %v283_v20 = vld [vmem:[%s449_s2] sm:$0xff] }
  0x1c   : > { %v254_v47 = vadd.s32 7, %v406_v7  ;;  %vm264_vm5 = vcmp.lt.s32.totalorder %v252_v33, 40  ;;  %v230_v49 = vsub.f32 %v206_v38, %v218_v39  ;;  %v240_v50 = vmul.f32 %v228_v35, %v228_v35 }
  0x1d   : > { %v285_v48 = vadd.f32 %v284_v41, %v273_v37  ;;  %v275_v51 = vsel %vm263_vm4, %v238_v36, 0.0  ;;  %v255_v54 = vadd.s32 8, %v406_v7  ;;  %vm265_vm6 = vcmp.lt.s32.totalorder %v253_v40, 40 }
  0x1e   : > { %v231_v56 = vsub.f32 %v207_v45, %v219_v46  ;;  %v241_v57 = vmul.f32 %v229_v42, %v229_v42  ;;  %v276_v58 = vsel %vm264_vm5, %v239_v43, 0.0  ;;  %v256_v61 = vadd.s32 9, %v406_v7 }
  0x1f   : > { %v286_v55 = vadd.f32 %v285_v48, %v274_v44  ;;  %vm266_vm7 = vcmp.lt.s32.totalorder %v254_v47, 40  ;;  %v232_v63 = vsub.f32 %v208_v52, %v220_v53  ;;  %v242_v0 = vmul.f32 %v230_v49, %v230_v49 }
  0x20   : > { %v277_v1 = vsel %vm265_vm6, %v240_v50, 0.0  ;;  %v257_v2 = vadd.s32 10, %v406_v7  ;;  %vm267_vm8 = vcmp.lt.s32.totalorder %v255_v54, 40  ;;  %v233_v4 = vsub.f32 %v209_v59, %v221_v60 }
  0x21   : > { %v287_v62 = vadd.f32 %v286_v55, %v275_v51  ;;  %v243_v5 = vmul.f32 %v231_v56, %v231_v56  ;;  %v278_v6 = vsel %vm266_vm7, %v241_v57, 0.0  ;;  %v258_v8 = vadd.s32 11, %v406_v7 }
  0x22   : > { %vm268_vm9 = vcmp.lt.s32.totalorder %v256_v61, 40  ;;  %v244_v10 = vmul.f32 %v232_v63, %v232_v63  ;;  %v279_v11 = vsel %vm267_vm8, %v242_v0, 0.0  ;;  %vm269_vm10 = vcmp.lt.s32.totalorder %v257_v2, 40 }
  0x23   : > { %v288_v3 = vadd.f32 %v287_v62, %v276_v58  ;;  %v245_v13 = vmul.f32 %v233_v4, %v233_v4  ;;  %v280_v14 = vsel %vm268_vm9, %v243_v5, 0.0  ;;  %vm270_vm11 = vcmp.lt.s32.totalorder %v258_v8, 40 }
  0x24   : > { %v281_v16 = vsel %vm269_vm10, %v244_v10, 0.0 }
  0x25   : > { %v289_v9 = vadd.f32 %v288_v3, %v277_v1  ;;  %v282_v18 = vsel %vm270_vm11, %v245_v13, 0.0 }
  0x27   : > { %v290_v12 = vadd.f32 %v289_v9, %v278_v6 }
  0x29   : > { %v291_v15 = vadd.f32 %v290_v12, %v279_v11 }
  0x2b   : > { %v292_v17 = vadd.f32 %v291_v15, %v280_v14 }
  0x2d   : > { %v293_v19 = vadd.f32 %v292_v17, %v281_v16 }
  0x2f   : > { %v294_v21 = vadd.f32 %v293_v19, %v282_v18 }
  0x31   : > { %v295_v7 = vadd.f32 %v294_v21, %v283_v20 }
  0x33   : > { %296 = vst [vmem:[%s449_s2] sm:$0xff] %v295_v7 }
  0x34 PF: > { %s12_s9 = sadd.s32 1, %s361_s9  }
  0x35   : > { %p9_p5 = scmp.ge.s32.totalorder %s12_s9, 6  }
  0x37   :  { %11 = sbr.rel (!%p9_p5) target bundleno = 1 (0x1), region = 61 }

</bundles_post_ra>
